<compile_context>
chip_gen: v5e
topology: v5e:2x2
jax: 0.10.0
libtpu: 0.0.40
codegen_flags: <defaults>
</compile_context>

<pallas_src>
import functools

import jax
import jax.numpy as jnp
from jax import lax
from jax.experimental import pallas as pl
from jax.experimental.pallas import tpu as pltpu

LANE = 128
SUBLANE = 8
MAX_BLOCK_ROWS = 4096                 # (4096, 128) f32 = 2 MiB per input block
VMEM_LIMIT_BYTES = 32 * 1024 * 1024   # explicit scoped-VMEM budget (all gens)


def _round_up(x, m):
    return (x + m - 1) // m * m


def _row_align(dtype):
    """Minimum sublane multiple for a dtype's (sublane, 128) tile."""
    itemsize = jnp.dtype(dtype).itemsize
    if itemsize >= 4:
        return 8
    if itemsize == 2:
        return 16
    return 32


def _focal_kernel(x_ref, t_ref, o_ref, *, alpha, gamma, inner_steps, steps,
                  num_splits, block_rows, total):
    s = pl.program_id(0)           # megacore split axis ("parallel")
    i = pl.program_id(1)           # reduction steps within split ("arbitrary")
    g = s * inner_steps + i        # global block index along the reduction

    @pl.when(i == 0)
    def _():
        o_ref[...] = jnp.zeros_like(o_ref)

    full_rows = total // LANE
    rem = total % LANE
    lane_rows = full_rows + (1 if rem else 0)
    # Static (trace-time) flags: does the final real block need a mask, and
    # does the 2-way split produce a phantom step that must be skipped?
    tail_mask = (lane_rows % block_rows != 0) or (rem != 0)
    has_phantom = (num_splits * inner_steps != steps)

    def _accum(masked):
        # Cast in-kernel so the HBM stream stays in the input's native dtype.
        x = x_ref[...].astype(jnp.float32)
        t = t_ref[...].astype(jnp.float32)

        # Shared log-sigmoid internals (one exp + one log1p for both a and b):
        #   L = log1p(exp(-|x|))
        #   a = log(sigmoid(x))     = min(x, 0) - L
        #   b = log(1 - sigmoid(x)) = -max(x, 0) - L
        # (1-p)^gamma = exp(gamma*b),  p^gamma = exp(gamma*a)
        L = jnp.log1p(jnp.exp(-jnp.abs(x)))
        a = jnp.minimum(x, 0.0) - L
        b = -jnp.maximum(x, 0.0) - L

        # loss = -alpha*(1-p)^g * t * log(p) - (1-alpha)*p^g * (1-t) * log(1-p)
        loss = ((-alpha) * t * jnp.exp(gamma * b) * a
                - (1.0 - alpha) * (1.0 - t) * jnp.exp(gamma * a) * b)

        if masked:
            # Element-exact mask for the final (possibly partial) block.
            row = lax.broadcasted_iota(jnp.int32, (block_rows, LANE), 0)
            grow = g * block_rows + row
            mask = grow < full_rows
            if rem:
                lane = lax.broadcasted_iota(jnp.int32, (block_rows, LANE), 1)
                mask = jnp.logical_or(
                    mask, jnp.logical_and(grow == full_rows, lane < rem))
            loss = jnp.where(mask, loss, 0.0)

        # Fold the (block_rows, 128) block into the resident (8, 128)
        # accumulator tile (pure VPU adds; the single cross-lane reduction
        # happens on the tiny partial output in the wrapper).
        o_ref[...] += jnp.sum(loss.reshape(-1, SUBLANE, LANE), axis=0)

    if not tail_mask and not has_phantom:
        _accum(False)                          # common, fully-aligned path
    else:
        last = steps - 1

        @pl.when(g < last if tail_mask else g <= last)
        def _():
            _accum(False)

        if tail_mask:
            @pl.when(g == last)
            def _():
                _accum(True)
        # g > last (phantom step of an uneven split) falls through: skipped.


def bce_focal_loss_with_logits(logits, target, *, gamma=0.2, alpha=0.6,
                               reduction="mean"):
    """Pallas implementation of BCEFocalLosswithLogits.forward (reduced)."""
    if reduction not in ("mean", "sum"):
        # TODO(synk): reduction='none' (per-element output) not implemented;
        # the module default is 'mean'.
        raise NotImplementedError("only 'mean' and 'sum' reductions supported")

    total = int(logits.size)
    xf = logits.reshape(-1)    # keep native dtype; the f32 cast is in-kernel
    tf = target.reshape(-1)

    lane_rows = -(-total // LANE)
    if lane_rows * LANE != total:
        # Rare path: flat size not a multiple of the 128-lane width, so a
        # small pad is unavoidable just to form the 2-D lane-dense view.
        # Padded elements are masked exactly in-kernel -> pad value irrelevant.
        pad = lane_rows * LANE - total
        xf = jnp.pad(xf, (0, pad))
        tf = jnp.pad(tf, (0, pad))

    x2 = xf.reshape(lane_rows, LANE)
    t2 = tf.reshape(lane_rows, LANE)

    row_align = max(_row_align(x2.dtype), _row_align(t2.dtype), SUBLANE)
    block_rows = min(MAX_BLOCK_ROWS, _round_up(lane_rows, row_align))
    steps = -(-lane_rows // block_rows)

    # Split the reduction across two TensorCores (v7x megacore) when there is
    # enough work; on 1-TC chips (v5e/v6e) the outer axis is a serial loop.
    # No padding is introduced by the split: an uneven split's phantom step is
    # skipped with pl.when and its DMA index is clamped in the index_map.
    num_splits = 2 if steps >= 2 else 1
    inner_steps = -(-steps // num_splits)

    kernel = functools.partial(
        _focal_kernel, alpha=float(alpha), gamma=float(gamma),
        inner_steps=inner_steps, steps=steps, num_splits=num_splits,
        block_rows=block_rows, total=total)

    def in_map(s, i, _inner=inner_steps, _last=steps - 1):
        # Clamp so a phantom step never issues an out-of-range block DMA.
        return (jnp.minimum(s * _inner + i, _last), 0)

    partials = pl.pallas_call(
        kernel,
        out_shape=jax.ShapeDtypeStruct((num_splits * SUBLANE, LANE),
                                       jnp.float32),
        grid_spec=pltpu.PrefetchScalarGridSpec(
            num_scalar_prefetch=0,
            grid=(num_splits, inner_steps),
            in_specs=[
                pl.BlockSpec((block_rows, LANE), in_map),
                pl.BlockSpec((block_rows, LANE), in_map),
            ],
            out_specs=pl.BlockSpec((SUBLANE, LANE), lambda s, i: (s, 0)),
        ),
        # TODO(synk): verify on v7x (xprof / pl.lower_as_mlir) that the size-2
        # "parallel" axis really shards across both TensorCores; if not,
        # switch that axis to pltpu.CORE_PARALLEL or an explicit pl.core_map.
        compiler_params=pltpu.CompilerParams(
            dimension_semantics=("parallel", "arbitrary"),
            vmem_limit_bytes=VMEM_LIMIT_BYTES),
    )(x2, t2)

    result = jnp.sum(partials)
    if reduction == "mean":
        result = result / jnp.float32(total)
    return result


def _reference(logits, target, gamma=0.2, alpha=0.6, reduction="mean"):
    # Naive formulation, mirroring the PyTorch module.
    p = jax.nn.sigmoid(logits.astype(jnp.float32))
    t = target.astype(jnp.float32)
    loss = (-alpha * (1.0 - p) ** gamma * t * jnp.log(p)
            - (1.0 - alpha) * p ** gamma * (1.0 - t) * jnp.log(1.0 - p))
    return loss.mean() if reduction == "mean" else loss.sum()


if __name__ == "__main__":
    key = jax.random.PRNGKey(0)
    k1, k2 = jax.random.split(key)

    # NCHW inputs, small shapes: batch=2, channels=4, spatial=16x16
    logits = jax.random.normal(k1, (2, 4, 16, 16), dtype=jnp.float32)
    target = jax.random.bernoulli(k2, 0.5, (2, 4, 16, 16)).astype(jnp.float32)

    loss_fn = jax.jit(functools.partial(bce_focal_loss_with_logits,
                                        gamma=0.2, alpha=0.6,
                                        reduction="mean"))
    loss = jax.block_until_ready(loss_fn(logits, target))

    ref = _reference(logits, target)
    assert jnp.allclose(loss, ref, rtol=1e-5, atol=1e-6), (loss, ref)

    print("KERNEL_OK")
</pallas_src>

<mosaic_0001>
module attributes {stable_mosaic.version = 11 : i64} {
  func.func @_focal_kernel(%arg0: i32, %arg1: i32, %arg2: memref<16x128xf32, #tpu.memory_space<vmem>>, %arg3: memref<16x128xf32, #tpu.memory_space<vmem>>, %arg4: memref<8x128xf32, #tpu.memory_space<vmem>>) attributes {dimension_semantics = [#tpu.dimension_semantics<parallel>, #tpu.dimension_semantics<arbitrary>], iteration_bounds = array<i64: 1, 1>, scalar_prefetch = 0 : i64, scratch_operands = 0 : i64, tpu.core_type = #tpu.core_type<tc>, window_params = [{transform_indices = @transform_0, window_bounds = array<i64: 16, 128>}, {transform_indices = @transform_1, window_bounds = array<i64: 16, 128>}, {transform_indices = @transform_2, window_bounds = array<i64: 8, 128>}]} {
    %c0_i32 = arith.constant 0 : i32
    %0 = arith.cmpi eq, %arg1, %c0_i32 : i32
    %1 = arith.extui %0 : i1 to i32
    %c0_i32_0 = arith.constant 0 : i32
    %2 = arith.cmpi ne, %1, %c0_i32_0 : i32
    scf.if %2 {
      %cst_17 = arith.constant 0.000000e+00 : f32
      %40 = vector.broadcast %cst_17 : f32 to vector<8x128xf32>
      %c0_18 = arith.constant 0 : index
      %c0_19 = arith.constant 0 : index
      %41 = vector.load %arg4[%c0_18, %c0_19] : memref<8x128xf32, #tpu.memory_space<vmem>>, vector<8x128xf32>
      tpu.vector_store %arg4[%c0_18, %c0_19], %40 {strides = array<i32>} : memref<8x128xf32, #tpu.memory_space<vmem>>, vector<8x128xf32>,
    } else {
    }
    %c0 = arith.constant 0 : index
    %c0_1 = arith.constant 0 : index
    %3 = vector.load %arg2[%c0, %c0_1] : memref<16x128xf32, #tpu.memory_space<vmem>>, vector<16x128xf32>
    %c0_2 = arith.constant 0 : index
    %c0_3 = arith.constant 0 : index
    %4 = vector.load %arg3[%c0_2, %c0_3] : memref<16x128xf32, #tpu.memory_space<vmem>>, vector<16x128xf32>
    %5 = math.absf %3 : vector<16x128xf32>
    %cst = arith.constant 0.000000e+00 : f32
    %6 = vector.broadcast %cst : f32 to vector<16x128xf32>
    %7 = arith.subf %6, %5 : vector<16x128xf32>
    %8 = math.exp %7 : vector<16x128xf32>
    %9 = math.log1p %8 : vector<16x128xf32>
    %cst_4 = arith.constant 0.000000e+00 : f32
    %10 = vector.broadcast %cst_4 : f32 to vector<16x128xf32>
    %11 = arith.minimumf %3, %10 : vector<16x128xf32>
    %12 = arith.subf %11, %9 : vector<16x128xf32>
    %cst_5 = arith.constant 0.000000e+00 : f32
    %13 = vector.broadcast %cst_5 : f32 to vector<16x128xf32>
    %14 = arith.maximumf %3, %13 : vector<16x128xf32>
    %cst_6 = arith.constant 0.000000e+00 : f32
    %15 = vector.broadcast %cst_6 : f32 to vector<16x128xf32>
    %16 = arith.subf %15, %14 : vector<16x128xf32>
    %17 = arith.subf %16, %9 : vector<16x128xf32>
    %cst_7 = arith.constant -6.000000e-01 : f32
    %18 = vector.broadcast %cst_7 : f32 to vector<16x128xf32>
    %19 = arith.mulf %18, %4 : vector<16x128xf32>
    %cst_8 = arith.constant 2.000000e-01 : f32
    %20 = vector.broadcast %cst_8 : f32 to vector<16x128xf32>
    %21 = arith.mulf %20, %17 : vector<16x128xf32>
    %22 = math.exp %21 : vector<16x128xf32>
    %23 = arith.mulf %19, %22 : vector<16x128xf32>
    %24 = arith.mulf %23, %12 : vector<16x128xf32>
    %cst_9 = arith.constant 1.000000e+00 : f32
    %25 = vector.broadcast %cst_9 : f32 to vector<16x128xf32>
    %26 = arith.subf %25, %4 : vector<16x128xf32>
    %cst_10 = arith.constant 4.000000e-01 : f32
    %27 = vector.broadcast %cst_10 : f32 to vector<16x128xf32>
    %28 = arith.mulf %27, %26 : vector<16x128xf32>
    %cst_11 = arith.constant 2.000000e-01 : f32
    %29 = vector.broadcast %cst_11 : f32 to vector<16x128xf32>
    %30 = arith.mulf %29, %12 : vector<16x128xf32>
    %31 = math.exp %30 : vector<16x128xf32>
    %32 = arith.mulf %28, %31 : vector<16x128xf32>
    %33 = arith.mulf %32, %17 : vector<16x128xf32>
    %34 = arith.subf %24, %33 : vector<16x128xf32>
    %c0_12 = arith.constant 0 : index
    %c0_13 = arith.constant 0 : index
    %35 = vector.load %arg4[%c0_12, %c0_13] : memref<8x128xf32, #tpu.memory_space<vmem>>, vector<8x128xf32>
    %36 = vector.shape_cast %34 : vector<16x128xf32> to vector<2x8x128xf32>
    %cst_14 = arith.constant dense<0.000000e+00> : vector<8x128xf32>
    %37 = vector.multi_reduction <add>, %36, %cst_14 [0] : vector<2x8x128xf32> to vector<8x128xf32>
    %38 = arith.addf %35, %37 : vector<8x128xf32>
    %c0_15 = arith.constant 0 : index
    %c0_16 = arith.constant 0 : index
    %39 = vector.load %arg4[%c0_15, %c0_16] : memref<8x128xf32, #tpu.memory_space<vmem>>, vector<8x128xf32>
    tpu.vector_store %arg4[%c0_15, %c0_16], %38 {strides = array<i32>} : memref<8x128xf32, #tpu.memory_space<vmem>>, vector<8x128xf32>,
    return
  }
  func.func @transform_0(%arg0: i32, %arg1: i32) -> (i32, i32) {
    %c1_i32 = arith.constant 1 : i32
    %0 = arith.muli %arg0, %c1_i32 : i32
    %1 = arith.addi %0, %arg1 : i32
    %c0_i32 = arith.constant 0 : i32
    %2 = arith.minsi %1, %c0_i32 : i32
    %c0_i32_0 = arith.constant 0 : i32
    %c0_i32_1 = arith.constant 0 : i32
    return %2, %c0_i32_0 : i32, i32
  }
  func.func @transform_1(%arg0: i32, %arg1: i32) -> (i32, i32) {
    %c1_i32 = arith.constant 1 : i32
    %0 = arith.muli %arg0, %c1_i32 : i32
    %1 = arith.addi %0, %arg1 : i32
    %c0_i32 = arith.constant 0 : i32
    %2 = arith.minsi %1, %c0_i32 : i32
    %c0_i32_0 = arith.constant 0 : i32
    %c0_i32_1 = arith.constant 0 : i32
    return %2, %c0_i32_0 : i32, i32
  }
  func.func @transform_2(%arg0: i32, %arg1: i32) -> (i32, i32) {
    %c0_i32 = arith.constant 0 : i32
    %c0_i32_0 = arith.constant 0 : i32
    return %arg0, %c0_i32 : i32, i32
  }
}

</mosaic_0001>

<bundles_post_ra>
// kernel: bce_focal_loss_with_logits.1
= control target key start
LH: loop header
LB: loop body
LE: loop exit
PB: predicated region body
PF: predicated region fallthrough
CT: control target
= control target key end

     0   :  { %s215_s0 = inlined_call_operand.vmem [shape: f32[16,128], index: 0, kind: input, shape index: {}]   ;;  %s216_s1 = inlined_call_operand.vmem [shape: f32[16,128], index: 1, kind: input, shape index: {}]   ;;  %s217_s2 = inlined_call_operand.vmem [shape: f32[8,128], index: 2, kind: output, shape index: {}]  }
   0x1   :  { %v80_v0 = vld [vmem:[%s215_s0] sm:$0xff]  ;;  %v81_v1 = vld [vmem:[%s215_s0 + $0x8] sm:$0xff] }
   0x2   :  { %v84_v2 = vand.u32 2147483647, %v80_v0  ;;  %v85_v3 = vand.u32 2147483647, %v81_v1  ;;  %v114_v17 = vmax.f32 %v80_v0, 0.0  ;;  %v115_v19 = vmax.f32 %v81_v1, 0.0 }
   0x3   :  { %v110_v23 = vmin.f32 %v80_v0, 0.0  ;;  %v111_v27 = vmin.f32 %v81_v1, 0.0  ;;  %v82_v40 = vld [vmem:[%s216_s1] sm:$0xff]  ;;  %v83_v43 = vld [vmem:[%s216_s1 + $0x8] sm:$0xff] }
   0x4   :  { %v86_v4 = vsub.f32 0.0, %v84_v2  ;;  %v87_v5 = vsub.f32 0.0, %v85_v3  ;;  %v116_v24 = vsub.f32 0.0, %v114_v17  ;;  %v117_v28 = vsub.f32 0.0, %v115_v19 }
   0x5   :  { %v132_v46 = vsub.f32 1.0, %v82_v40  ;;  %v133_v47 = vsub.f32 1.0, %v83_v43  ;;  %v120_v48 = vmul.f32 -0.6, %v82_v40  ;;  %v121_v49 = vmul.f32 -0.6, %v83_v43 }
   0x6   :  { %v88_v6 = vmul.f32 1.442695, %v86_v4  ;;  %v90_v7 = vmul.f32 1.442695, %v87_v5 }
   0x7   :  { %v134_v50 = vmul.f32 0.4, %v132_v46  ;;  %v135_v52 = vmul.f32 0.4, %v133_v47 }
   0x8   :  { %169 = vpow2.f32 %v88_v6 }
   0x9   :  { %171 = vpow2.f32 %v90_v7 }
   0xe   :  { %v170_v8 = vpop.eup %169 }
   0xf   :  { %v172_v9 = vpop.eup %171  ;;  %v92_v10 = vadd.f32 1.0, %v170_v8  ;;  %v95_v11 = vmul.f32 -0.5, %v170_v8  ;;  %v98_v15 = vand.u32 2147483647, %v170_v8 }
  0x10   :  { %v101_v12 = vadd.f32 1.0, %v172_v9  ;;  %v104_v13 = vmul.f32 -0.5, %v172_v9  ;;  %v107_v18 = vand.u32 2147483647, %v172_v9 }
  0x11   :  { %173 = vlog2.f32 %v92_v10  ;;  %v96_v14 = vadd.f32 1.0, %v95_v11  ;;  %vm99_vm0 = vcmp.lt.f32.partialorder %v98_v15, 0.0004427343 }
  0x12   :  { %175 = vlog2.f32 %v101_v12  ;;  %v105_v16 = vadd.f32 1.0, %v104_v13  ;;  %vm108_vm1 = vcmp.lt.f32.partialorder %v107_v18, 0.0004427343 }
  0x13   :  { %v97_v20 = vmul.f32 %v170_v8, %v96_v14 }
  0x14   :  { %v106_v22 = vmul.f32 %v172_v9, %v105_v16 }
  0x17   :  { %v174_v21 = vpop.eup %173 }
  0x18   :  { %v176_v25 = vpop.eup %175  ;;  %v94_v26 = vmul.f32 0.6931472, %v174_v21 }
  0x19   :  { %v103_v29 = vmul.f32 0.6931472, %v176_v25 }
  0x1a   :  { %v100_v30 = vsel %vm99_vm0, %v97_v20, %v94_v26 }
  0x1b   :  { %v109_v31 = vsel %vm108_vm1, %v106_v22, %v103_v29  ;;  %v112_v32 = vsub.f32 %v110_v23, %v100_v30  ;;  %v118_v33 = vsub.f32 %v116_v24, %v100_v30 }
  0x1c   :  { %v113_v34 = vsub.f32 %v111_v27, %v109_v31  ;;  %v119_v35 = vsub.f32 %v117_v28, %v109_v31 }
  0x1d   :  { %v122_v36 = vmul.f32 0.2, %v118_v33  ;;  %v136_v37 = vmul.f32 0.2, %v112_v32 }
  0x1e   :  { %v123_v38 = vmul.f32 0.2, %v119_v35  ;;  %v137_v39 = vmul.f32 0.2, %v113_v34 }
  0x1f   :  { %v124_v41 = vmul.f32 1.442695, %v122_v36  ;;  %v138_v42 = vmul.f32 1.442695, %v136_v37 }
  0x20   :  { %v126_v44 = vmul.f32 1.442695, %v123_v38  ;;  %v140_v45 = vmul.f32 1.442695, %v137_v39 }
  0x21   :  { %177 = vpow2.f32 %v124_v41 }
  0x22   :  { %179 = vpow2.f32 %v126_v44 }
  0x23   :  { %181 = vpow2.f32 %v138_v42 }
  0x24   :  { %183 = vpow2.f32 %v140_v45 }
  0x27   :  { %v178_v51 = vpop.eup %177 }
  0x28   :  { %v180_v53 = vpop.eup %179  ;;  %v128_v54 = vmul.f32 %v178_v51, %v120_v48 }
  0x29   :  { %v182_v55 = vpop.eup %181  ;;  %v129_v56 = vmul.f32 %v180_v53, %v121_v49 }
  0x2a   :  { %v184_v57 = vpop.eup %183  ;;  %v130_v58 = vmul.f32 %v128_v54, %v112_v32  ;;  %v142_v59 = vmul.f32 %v182_v55, %v134_v50 }
  0x2b   :  { %v131_v60 = vmul.f32 %v129_v56, %v113_v34  ;;  %v143_v61 = vmul.f32 %v184_v57, %v135_v52 }
  0x2c   :  { %v144_v62 = vmul.f32 %v142_v59, %v118_v33 }
  0x2d   :  { %v145_v63 = vmul.f32 %v143_v61, %v119_v35 }
  0x2e   :  { %v146_v0 = vsub.f32 %v130_v58, %v144_v62 }
  0x2f   :  { %v147_v1 = vsub.f32 %v131_v60, %v145_v63 }
  0x31   :  { %v149_v2 = vadd.f32 %v147_v1, %v146_v0 }
  0x33   :  { %151 = vst [vmem:[%s217_s2] sm:$0xff] %v149_v2 }

</bundles_post_ra>
